<compile_context>
chip_gen: v5e
topology: v5e:2x2
jax: 0.10.0
libtpu: 0.0.40
codegen_flags: <defaults>
</compile_context>

<pallas_src>
import jax
import jax.numpy as jnp
from jax.experimental import pallas as pl
from jax.experimental.pallas import tpu as pltpu

# ----------------------------- config (small) --------------------------------
D_LAYERS = 4                  # module default D=4
W_HIDDEN = 32                 # module default W=256; small hidden width for test
MULTIRES = 6
N_FEAT_IN = 2                 # n_feat_in
N_PT_FEAT = 4                 # n_pt_feat
PE_CH = MULTIRES * 2 * 3 + 3                    # 39
INPUT_CH = N_FEAT_IN * (N_PT_FEAT + PE_CH)      # 2 * (4 + 39) = 86
Z_CH = N_FEAT_IN * N_PT_FEAT                    # 8
X0_ROWS = ((Z_CH + PE_CH + 7) // 8) * 8         # 48 (47 used + 1 zero pad row)


# --------------------------- reference pos. enc -------------------------------
def positional_encoding(x, multires):
    # NeRF-style PE: [x, sin(2^k x), cos(2^k x) for k in 0..multires-1]
    feats = [x]
    for k in range(multires):
        freq = 2.0 ** k
        feats.append(jnp.sin(freq * x))
        feats.append(jnp.cos(freq * x))
    return jnp.concatenate(feats, axis=-1)


# ------------------------------ Pallas kernel ---------------------------------
def lfn_kernel(rd_ref, z_ref,
               w0_ref, b0_ref, w1_ref, b1_ref, w2_ref, b2_ref, w3_ref, b3_ref,
               wr_ref, br_ref, o_ref, x0_ref):
    # Transposed layout: rays on the lane axis.
    #   rd_ref [3, tm] f32, z_ref [8, tm] bf16, weights [out, in] bf16,
    #   biases [out, 1] f32, o_ref [3, tm] f32, x0_ref scratch [48, tm] f32.
    tm = rd_ref.shape[1]
    rd = rd_ref[...]

    # Assemble the fused layer-0 input slab directly in VMEM scratch:
    #   rows 0:8   -> z latent codes (feature 0 then feature 1)
    #   rows 8:47  -> NeRF PE [rd, sin(2^k rd), cos(2^k rd)]_{k=0..5}
    #   row  47    -> zeros (fused w0 has a matching zero column)
    x0_ref[0:Z_CH, :] = z_ref[...].astype(jnp.float32)
    x0_ref[Z_CH:Z_CH + 3, :] = rd

    # Base octave on the EUP; higher octaves via double-angle recurrence (VPU).
    s = jnp.sin(rd)
    c = jnp.cos(rd)
    row = Z_CH + 3
    for k in range(MULTIRES):
        if k > 0:
            s, c = 2.0 * s * c, 2.0 * c * c - 1.0      # sin(2x), cos(2x)
        x0_ref[row:row + 3, :] = s
        x0_ref[row + 3:row + 6, :] = c
        row += 6
    x0_ref[row:X0_ROWS, :] = jnp.zeros((X0_ROWS - row, tm), jnp.float32)

    # Layer 0: single fused matmul (bf16 MXU inputs, f32 accumulation).
    acc = jnp.dot(w0_ref[...], x0_ref[...].astype(jnp.bfloat16),
                  preferred_element_type=jnp.float32)          # [W, tm]
    h = jnp.maximum(acc + b0_ref[...], 0.0)

    # Remaining DenseLayers (Linear + ReLU).
    for w_ref, b_ref in ((w1_ref, b1_ref), (w2_ref, b2_ref), (w3_ref, b3_ref)):
        acc = jnp.dot(w_ref[...], h.astype(jnp.bfloat16),
                      preferred_element_type=jnp.float32)
        h = jnp.maximum(acc + b_ref[...], 0.0)

    # rgb_linear + sigmoid (EUP exp + approx reciprocal); lane-dense [3, tm] store.
    out = jnp.dot(wr_ref[...], h.astype(jnp.bfloat16),
                  preferred_element_type=jnp.float32) + br_ref[...]
    o_ref[...] = pl.reciprocal(1.0 + jnp.exp(-out), approx=True)


# ------------------------------- wrapper --------------------------------------
def _round_up(x, m):
    return ((x + m - 1) // m) * m


def light_field_net(ray_dirs, z, params, *, tm=2048):
    """ray_dirs: [B, R, 3], z: [B, R, n_feat_in, n_pt_feat] -> rgb [B, R, 3]."""
    n_batch, n_rays, n_feat, feat_ch = z.shape
    assert n_feat == N_FEAT_IN and feat_ch == N_PT_FEAT
    M = n_batch * n_rays

    # Pre-transpose the small inputs so rays land on the lane axis.
    rd_t = ray_dirs.reshape(M, 3).astype(jnp.float32).T        # [3, M]
    z_t = z.reshape(M, Z_CH).astype(jnp.bfloat16).T            # [8, M]

    # Repack layer-0 weights for the fused-PE, transposed kernel layout.
    # Original x columns per feature f: [z_f (4), enc (39)]; the encoding is
    # identical for every feature (layer_modulation=False), so enc weight
    # row-blocks can be summed across features.
    w0, b0, w1, b1, w2, b2, w3, b3, wr, br = params
    blk = N_PT_FEAT + PE_CH
    w0_z = jnp.concatenate(
        [w0[f * blk: f * blk + N_PT_FEAT] for f in range(N_FEAT_IN)], axis=0)
    w0_e = sum(w0[f * blk + N_PT_FEAT: (f + 1) * blk] for f in range(N_FEAT_IN))
    w0_f = jnp.concatenate(
        [w0_z, w0_e,
         jnp.zeros((X0_ROWS - Z_CH - PE_CH, w0.shape[1]), w0.dtype)], axis=0)

    tW = lambda a: a.T.astype(jnp.bfloat16)        # weight: [out, in] bf16
    tB = lambda a: a.reshape(-1, 1).astype(jnp.float32)   # bias: [out, 1] f32
    weights = [tW(w0_f), tB(b0), tW(w1), tB(b1), tW(w2), tB(b2),
               tW(w3), tB(b3), tW(wr), tB(br)]

    # Tile selection: lane axis => 128-aligned; big enough to amortize the
    # ~0.35 us/grid-step overhead, capped so the grid keeps >=4 steps when the
    # problem allows (v7x megacore sharding of the single "parallel" axis).
    tm = max(128, _round_up(int(tm), 128))
    tm = min(tm, max(128, _round_up(pl.cdiv(M, 4), 128)))
    grid = (pl.cdiv(M, tm),)        # ragged tail handled by Pallas (no pad copy)

    flops = 2 * M * (X0_ROWS * W_HIDDEN
                     + (D_LAYERS - 1) * W_HIDDEN * W_HIDDEN + W_HIDDEN * 3)
    transcendentals = M * (3 * 2 + 3 + 3)   # base-octave sin/cos + exp + rcp
    weight_bytes = sum(int(a.size) * a.dtype.itemsize for a in weights)
    bytes_accessed = (M * 3 * 4            # ray dirs (f32)
                      + M * Z_CH * 2       # z (bf16)
                      + weight_bytes
                      + M * 3 * 4)         # rgb out (f32)

    out_t = pl.pallas_call(
        lfn_kernel,
        out_shape=jax.ShapeDtypeStruct((3, M), jnp.float32),
        grid_spec=pltpu.PrefetchScalarGridSpec(
            num_scalar_prefetch=0,
            grid=grid,
            in_specs=[
                pl.BlockSpec((3, tm), lambda i: (0, i)),       # ray dirs tile
                pl.BlockSpec((Z_CH, tm), lambda i: (0, i)),    # z tile
            ] + [pl.BlockSpec(a.shape, lambda i: (0, 0)) for a in weights],
            out_specs=pl.BlockSpec((3, tm), lambda i: (0, i)),
            scratch_shapes=[pltpu.VMEM((X0_ROWS, tm), jnp.float32)],
        ),
        compiler_params=pltpu.CompilerParams(
            dimension_semantics=("parallel",)),
        cost_estimate=pl.CostEstimate(
            flops=flops, transcendentals=transcendentals,
            bytes_accessed=bytes_accessed),
    )(rd_t, z_t, *weights)

    return out_t.T.reshape(n_batch, n_rays, 3)


# -------------------------- deterministic params -------------------------------
def init_params(key):
    """PyTorch-Linear-style uniform(+-1/sqrt(fan_in)) init, deterministic.

    Stored in the ORIGINAL module layout (w0: [INPUT_CH, W]); the wrapper
    repacks/transposes for the fused-PE kernel.
    """
    dims = [(INPUT_CH, W_HIDDEN)] + [(W_HIDDEN, W_HIDDEN)] * (D_LAYERS - 1) \
           + [(W_HIDDEN, 3)]
    params = []
    for (fan_in, fan_out) in dims:
        key, kw, kb = jax.random.split(key, 3)
        bound = 1.0 / jnp.sqrt(fan_in)
        w = jax.random.uniform(kw, (fan_in, fan_out), jnp.float32, -bound, bound)
        b = jax.random.uniform(kb, (1, fan_out), jnp.float32, -bound, bound)
        params += [w, b]
    return tuple(params)


# ------------------------------ pure-JAX ref -----------------------------------
def light_field_net_ref(ray_dirs, z, params):
    n_batch, n_rays, n_feat, _ = z.shape
    rd = jnp.repeat(ray_dirs[..., None, :], n_feat, axis=2)
    enc = positional_encoding(rd, MULTIRES)
    h = jnp.concatenate([z, enc], axis=-1).reshape(n_batch * n_rays, INPUT_CH)
    w0, b0, w1, b1, w2, b2, w3, b3, wr, br = params
    for w, b in ((w0, b0), (w1, b1), (w2, b2), (w3, b3)):
        h = jnp.maximum(h @ w + b, 0.0)
    out = jax.nn.sigmoid(h @ wr + br)
    return out.reshape(n_batch, n_rays, 3)


# --------------------------------- main ----------------------------------------
if __name__ == "__main__":
    key = jax.random.PRNGKey(0)
    k_rd, k_z, k_p = jax.random.split(key, 3)

    # Small but big enough to exercise a multi-step grid + ragged tail block.
    B, N_RAYS = 2, 300
    ray_dirs = jax.random.normal(k_rd, (B, N_RAYS, 3), jnp.float32)
    ray_dirs = ray_dirs / jnp.linalg.norm(ray_dirs, axis=-1, keepdims=True)
    z = jax.random.normal(k_z, (B, N_RAYS, N_FEAT_IN, N_PT_FEAT), jnp.float32)

    params = init_params(k_p)

    rgb = light_field_net(ray_dirs, z, params)
    rgb = jax.block_until_ready(rgb)

    rgb_ref = light_field_net_ref(ray_dirs, z, params)
    assert rgb.shape == (B, N_RAYS, 3)
    assert bool(jnp.all(jnp.isfinite(rgb)))
    # bf16 weights/activations (f32 accumulation) + approx sigmoid reciprocal
    # + double-angle PE recurrence vs pure-f32 reference.
    assert jnp.allclose(rgb, rgb_ref, atol=3e-2, rtol=3e-2), \
        float(jnp.max(jnp.abs(rgb - rgb_ref)))

    print("KERNEL_OK")
</pallas_src>

<mosaic_0001>
module attributes {stable_mosaic.version = 11 : i64} {
  func.func @lfn_kernel(%arg0: i32, %arg1: memref<3x256xf32, #tpu.memory_space<vmem>>, %arg2: memref<8x256xbf16, #tpu.memory_space<vmem>>, %arg3: memref<32x48xbf16, #tpu.memory_space<vmem>>, %arg4: memref<32x1xf32, #tpu.memory_space<vmem>>, %arg5: memref<32x32xbf16, #tpu.memory_space<vmem>>, %arg6: memref<32x1xf32, #tpu.memory_space<vmem>>, %arg7: memref<32x32xbf16, #tpu.memory_space<vmem>>, %arg8: memref<32x1xf32, #tpu.memory_space<vmem>>, %arg9: memref<32x32xbf16, #tpu.memory_space<vmem>>, %arg10: memref<32x1xf32, #tpu.memory_space<vmem>>, %arg11: memref<3x32xbf16, #tpu.memory_space<vmem>>, %arg12: memref<3x1xf32, #tpu.memory_space<vmem>>, %arg13: memref<3x256xf32, #tpu.memory_space<vmem>>, %arg14: memref<48x256xf32, #tpu.memory_space<vmem>>) attributes {dimension_semantics = [#tpu.dimension_semantics<parallel>], iteration_bounds = array<i64: 3>, scalar_prefetch = 0 : i64, scratch_operands = 1 : i64, tpu.core_type = #tpu.core_type<tc>, window_params = [{transform_indices = @transform_0, window_bounds = array<i64: 3, 256>}, {transform_indices = @transform_1, window_bounds = array<i64: 8, 256>}, {pipeline_mode = #tpu.pipeline_mode<synchronous>, transform_indices = @transform_2, window_bounds = array<i64: 32, 48>}, {pipeline_mode = #tpu.pipeline_mode<synchronous>, transform_indices = @transform_3, window_bounds = array<i64: 32, 1>}, {pipeline_mode = #tpu.pipeline_mode<synchronous>, transform_indices = @transform_4, window_bounds = array<i64: 32, 32>}, {pipeline_mode = #tpu.pipeline_mode<synchronous>, transform_indices = @transform_5, window_bounds = array<i64: 32, 1>}, {pipeline_mode = #tpu.pipeline_mode<synchronous>, transform_indices = @transform_6, window_bounds = array<i64: 32, 32>}, {pipeline_mode = #tpu.pipeline_mode<synchronous>, transform_indices = @transform_7, window_bounds = array<i64: 32, 1>}, {pipeline_mode = #tpu.pipeline_mode<synchronous>, transform_indices = @transform_8, window_bounds = array<i64: 32, 32>}, {pipeline_mode = #tpu.pipeline_mode<synchronous>, transform_indices = @transform_9, window_bounds = array<i64: 32, 1>}, {pipeline_mode = #tpu.pipeline_mode<synchronous>, transform_indices = @transform_10, window_bounds = array<i64: 3, 32>}, {pipeline_mode = #tpu.pipeline_mode<synchronous>, transform_indices = @transform_11, window_bounds = array<i64: 3, 1>}, {transform_indices = @transform_12, window_bounds = array<i64: 3, 256>}]} {
    %c0 = arith.constant 0 : index
    %c0_0 = arith.constant 0 : index
    %0 = vector.load %arg1[%c0, %c0_0] : memref<3x256xf32, #tpu.memory_space<vmem>>, vector<3x256xf32>
    %c0_1 = arith.constant 0 : index
    %c0_2 = arith.constant 0 : index
    %1 = vector.load %arg2[%c0_1, %c0_2] : memref<8x256xbf16, #tpu.memory_space<vmem>>, vector<8x256xbf16>
    %2 = arith.extf %1 : vector<8x256xbf16> to vector<8x256xf32>
    %c0_3 = arith.constant 0 : index
    %c0_4 = arith.constant 0 : index
    %3 = vector.load %arg14[%c0_3, %c0_4] : memref<48x256xf32, #tpu.memory_space<vmem>>, vector<8x256xf32>
    tpu.vector_store %arg14[%c0_3, %c0_4], %2 {strides = array<i32>} : memref<48x256xf32, #tpu.memory_space<vmem>>, vector<8x256xf32>,
    %c8 = arith.constant 8 : index
    %c0_5 = arith.constant 0 : index
    %4 = vector.load %arg14[%c8, %c0_5] : memref<48x256xf32, #tpu.memory_space<vmem>>, vector<3x256xf32>
    tpu.vector_store %arg14[%c8, %c0_5], %0 {strides = array<i32>} : memref<48x256xf32, #tpu.memory_space<vmem>>, vector<3x256xf32>,
    %5 = math.sin %0 : vector<3x256xf32>
    %6 = math.cos %0 : vector<3x256xf32>
    %c11 = arith.constant 11 : index
    %c0_6 = arith.constant 0 : index
    %7 = vector.load %arg14[%c11, %c0_6] : memref<48x256xf32, #tpu.memory_space<vmem>>, vector<3x256xf32>
    tpu.vector_store %arg14[%c11, %c0_6], %5 {strides = array<i32>} : memref<48x256xf32, #tpu.memory_space<vmem>>, vector<3x256xf32>,
    %c14 = arith.constant 14 : index
    %c0_7 = arith.constant 0 : index
    %8 = vector.load %arg14[%c14, %c0_7] : memref<48x256xf32, #tpu.memory_space<vmem>>, vector<3x256xf32>
    tpu.vector_store %arg14[%c14, %c0_7], %6 {strides = array<i32>} : memref<48x256xf32, #tpu.memory_space<vmem>>, vector<3x256xf32>,
    %cst = arith.constant 2.000000e+00 : f32
    %9 = vector.broadcast %cst : f32 to vector<3x256xf32>
    %10 = arith.mulf %9, %5 : vector<3x256xf32>
    %11 = arith.mulf %10, %6 : vector<3x256xf32>
    %cst_8 = arith.constant 2.000000e+00 : f32
    %12 = vector.broadcast %cst_8 : f32 to vector<3x256xf32>
    %13 = arith.mulf %12, %6 : vector<3x256xf32>
    %14 = arith.mulf %13, %6 : vector<3x256xf32>
    %cst_9 = arith.constant 1.000000e+00 : f32
    %15 = vector.broadcast %cst_9 : f32 to vector<3x256xf32>
    %16 = arith.subf %14, %15 : vector<3x256xf32>
    %c17 = arith.constant 17 : index
    %c0_10 = arith.constant 0 : index
    %17 = vector.load %arg14[%c17, %c0_10] : memref<48x256xf32, #tpu.memory_space<vmem>>, vector<3x256xf32>
    tpu.vector_store %arg14[%c17, %c0_10], %11 {strides = array<i32>} : memref<48x256xf32, #tpu.memory_space<vmem>>, vector<3x256xf32>,
    %c20 = arith.constant 20 : index
    %c0_11 = arith.constant 0 : index
    %18 = vector.load %arg14[%c20, %c0_11] : memref<48x256xf32, #tpu.memory_space<vmem>>, vector<3x256xf32>
    tpu.vector_store %arg14[%c20, %c0_11], %16 {strides = array<i32>} : memref<48x256xf32, #tpu.memory_space<vmem>>, vector<3x256xf32>,
    %cst_12 = arith.constant 2.000000e+00 : f32
    %19 = vector.broadcast %cst_12 : f32 to vector<3x256xf32>
    %20 = arith.mulf %19, %11 : vector<3x256xf32>
    %21 = arith.mulf %20, %16 : vector<3x256xf32>
    %cst_13 = arith.constant 2.000000e+00 : f32
    %22 = vector.broadcast %cst_13 : f32 to vector<3x256xf32>
    %23 = arith.mulf %22, %16 : vector<3x256xf32>
    %24 = arith.mulf %23, %16 : vector<3x256xf32>
    %cst_14 = arith.constant 1.000000e+00 : f32
    %25 = vector.broadcast %cst_14 : f32 to vector<3x256xf32>
    %26 = arith.subf %24, %25 : vector<3x256xf32>
    %c23 = arith.constant 23 : index
    %c0_15 = arith.constant 0 : index
    %27 = vector.load %arg14[%c23, %c0_15] : memref<48x256xf32, #tpu.memory_space<vmem>>, vector<3x256xf32>
    tpu.vector_store %arg14[%c23, %c0_15], %21 {strides = array<i32>} : memref<48x256xf32, #tpu.memory_space<vmem>>, vector<3x256xf32>,
    %c26 = arith.constant 26 : index
    %c0_16 = arith.constant 0 : index
    %28 = vector.load %arg14[%c26, %c0_16] : memref<48x256xf32, #tpu.memory_space<vmem>>, vector<3x256xf32>
    tpu.vector_store %arg14[%c26, %c0_16], %26 {strides = array<i32>} : memref<48x256xf32, #tpu.memory_space<vmem>>, vector<3x256xf32>,
    %cst_17 = arith.constant 2.000000e+00 : f32
    %29 = vector.broadcast %cst_17 : f32 to vector<3x256xf32>
    %30 = arith.mulf %29, %21 : vector<3x256xf32>
    %31 = arith.mulf %30, %26 : vector<3x256xf32>
    %cst_18 = arith.constant 2.000000e+00 : f32
    %32 = vector.broadcast %cst_18 : f32 to vector<3x256xf32>
    %33 = arith.mulf %32, %26 : vector<3x256xf32>
    %34 = arith.mulf %33, %26 : vector<3x256xf32>
    %cst_19 = arith.constant 1.000000e+00 : f32
    %35 = vector.broadcast %cst_19 : f32 to vector<3x256xf32>
    %36 = arith.subf %34, %35 : vector<3x256xf32>
    %c29 = arith.constant 29 : index
    %c0_20 = arith.constant 0 : index
    %37 = vector.load %arg14[%c29, %c0_20] : memref<48x256xf32, #tpu.memory_space<vmem>>, vector<3x256xf32>
    tpu.vector_store %arg14[%c29, %c0_20], %31 {strides = array<i32>} : memref<48x256xf32, #tpu.memory_space<vmem>>, vector<3x256xf32>,
    %c32 = arith.constant 32 : index
    %c0_21 = arith.constant 0 : index
    %38 = vector.load %arg14[%c32, %c0_21] : memref<48x256xf32, #tpu.memory_space<vmem>>, vector<3x256xf32>
    tpu.vector_store %arg14[%c32, %c0_21], %36 {strides = array<i32>} : memref<48x256xf32, #tpu.memory_space<vmem>>, vector<3x256xf32>,
    %cst_22 = arith.constant 2.000000e+00 : f32
    %39 = vector.broadcast %cst_22 : f32 to vector<3x256xf32>
    %40 = arith.mulf %39, %31 : vector<3x256xf32>
    %41 = arith.mulf %40, %36 : vector<3x256xf32>
    %cst_23 = arith.constant 2.000000e+00 : f32
    %42 = vector.broadcast %cst_23 : f32 to vector<3x256xf32>
    %43 = arith.mulf %42, %36 : vector<3x256xf32>
    %44 = arith.mulf %43, %36 : vector<3x256xf32>
    %cst_24 = arith.constant 1.000000e+00 : f32
    %45 = vector.broadcast %cst_24 : f32 to vector<3x256xf32>
    %46 = arith.subf %44, %45 : vector<3x256xf32>
    %c35 = arith.constant 35 : index
    %c0_25 = arith.constant 0 : index
    %47 = vector.load %arg14[%c35, %c0_25] : memref<48x256xf32, #tpu.memory_space<vmem>>, vector<3x256xf32>
    tpu.vector_store %arg14[%c35, %c0_25], %41 {strides = array<i32>} : memref<48x256xf32, #tpu.memory_space<vmem>>, vector<3x256xf32>,
    %c38 = arith.constant 38 : index
    %c0_26 = arith.constant 0 : index
    %48 = vector.load %arg14[%c38, %c0_26] : memref<48x256xf32, #tpu.memory_space<vmem>>, vector<3x256xf32>
    tpu.vector_store %arg14[%c38, %c0_26], %46 {strides = array<i32>} : memref<48x256xf32, #tpu.memory_space<vmem>>, vector<3x256xf32>,
    %cst_27 = arith.constant 2.000000e+00 : f32
    %49 = vector.broadcast %cst_27 : f32 to vector<3x256xf32>
    %50 = arith.mulf %49, %41 : vector<3x256xf32>
    %51 = arith.mulf %50, %46 : vector<3x256xf32>
    %cst_28 = arith.constant 2.000000e+00 : f32
    %52 = vector.broadcast %cst_28 : f32 to vector<3x256xf32>
    %53 = arith.mulf %52, %46 : vector<3x256xf32>
    %54 = arith.mulf %53, %46 : vector<3x256xf32>
    %cst_29 = arith.constant 1.000000e+00 : f32
    %55 = vector.broadcast %cst_29 : f32 to vector<3x256xf32>
    %56 = arith.subf %54, %55 : vector<3x256xf32>
    %c41 = arith.constant 41 : index
    %c0_30 = arith.constant 0 : index
    %57 = vector.load %arg14[%c41, %c0_30] : memref<48x256xf32, #tpu.memory_space<vmem>>, vector<3x256xf32>
    tpu.vector_store %arg14[%c41, %c0_30], %51 {strides = array<i32>} : memref<48x256xf32, #tpu.memory_space<vmem>>, vector<3x256xf32>,
    %c44 = arith.constant 44 : index
    %c0_31 = arith.constant 0 : index
    %58 = vector.load %arg14[%c44, %c0_31] : memref<48x256xf32, #tpu.memory_space<vmem>>, vector<3x256xf32>
    tpu.vector_store %arg14[%c44, %c0_31], %56 {strides = array<i32>} : memref<48x256xf32, #tpu.memory_space<vmem>>, vector<3x256xf32>,
    %cst_32 = arith.constant 0.000000e+00 : f32
    %59 = vector.broadcast %cst_32 : f32 to vector<1x256xf32>
    %c47 = arith.constant 47 : index
    %c0_33 = arith.constant 0 : index
    %60 = vector.load %arg14[%c47, %c0_33] : memref<48x256xf32, #tpu.memory_space<vmem>>, vector<1x256xf32>
    tpu.vector_store %arg14[%c47, %c0_33], %59 {strides = array<i32>} : memref<48x256xf32, #tpu.memory_space<vmem>>, vector<1x256xf32>,
    %c0_34 = arith.constant 0 : index
    %c0_35 = arith.constant 0 : index
    %61 = vector.load %arg3[%c0_34, %c0_35] : memref<32x48xbf16, #tpu.memory_space<vmem>>, vector<32x48xbf16>
    %c0_36 = arith.constant 0 : index
    %c0_37 = arith.constant 0 : index
    %62 = vector.load %arg14[%c0_36, %c0_37] : memref<48x256xf32, #tpu.memory_space<vmem>>, vector<48x256xf32>
    %63 = arith.truncf %62 : vector<48x256xf32> to vector<48x256xbf16>
    %cst_38 = arith.constant dense<0.000000e+00> : vector<32x256xf32>
    %64 = tpu.matmul %61, %63, %cst_38 {dimension_numbers = #tpu.dot_dimension_numbers<[1], [0], [0], [1], [0, 0, 1, 1], [], []>} : vector<32x48xbf16>, vector<48x256xbf16>, vector<32x256xf32> -> vector<32x256xf32>
    %c0_39 = arith.constant 0 : index
    %c0_40 = arith.constant 0 : index
    %65 = vector.load %arg4[%c0_39, %c0_40] : memref<32x1xf32, #tpu.memory_space<vmem>>, vector<32x1xf32>
    %66 = vector.broadcast %65 : vector<32x1xf32> to vector<32x256xf32>
    %67 = arith.addf %64, %66 : vector<32x256xf32>
    %cst_41 = arith.constant 0.000000e+00 : f32
    %68 = vector.broadcast %cst_41 : f32 to vector<32x256xf32>
    %69 = arith.maximumf %67, %68 : vector<32x256xf32>
    %c0_42 = arith.constant 0 : index
    %c0_43 = arith.constant 0 : index
    %70 = vector.load %arg5[%c0_42, %c0_43] : memref<32x32xbf16, #tpu.memory_space<vmem>>, vector<32x32xbf16>
    %71 = arith.truncf %69 : vector<32x256xf32> to vector<32x256xbf16>
    %cst_44 = arith.constant dense<0.000000e+00> : vector<32x256xf32>
    %72 = tpu.matmul %70, %71, %cst_44 {dimension_numbers = #tpu.dot_dimension_numbers<[1], [0], [0], [1], [0, 0, 1, 1], [], []>} : vector<32x32xbf16>, vector<32x256xbf16>, vector<32x256xf32> -> vector<32x256xf32>
    %c0_45 = arith.constant 0 : index
    %c0_46 = arith.constant 0 : index
    %73 = vector.load %arg6[%c0_45, %c0_46] : memref<32x1xf32, #tpu.memory_space<vmem>>, vector<32x1xf32>
    %74 = vector.broadcast %73 : vector<32x1xf32> to vector<32x256xf32>
    %75 = arith.addf %72, %74 : vector<32x256xf32>
    %cst_47 = arith.constant 0.000000e+00 : f32
    %76 = vector.broadcast %cst_47 : f32 to vector<32x256xf32>
    %77 = arith.maximumf %75, %76 : vector<32x256xf32>
    %c0_48 = arith.constant 0 : index
    %c0_49 = arith.constant 0 : index
    %78 = vector.load %arg7[%c0_48, %c0_49] : memref<32x32xbf16, #tpu.memory_space<vmem>>, vector<32x32xbf16>
    %79 = arith.truncf %77 : vector<32x256xf32> to vector<32x256xbf16>
    %cst_50 = arith.constant dense<0.000000e+00> : vector<32x256xf32>
    %80 = tpu.matmul %78, %79, %cst_50 {dimension_numbers = #tpu.dot_dimension_numbers<[1], [0], [0], [1], [0, 0, 1, 1], [], []>} : vector<32x32xbf16>, vector<32x256xbf16>, vector<32x256xf32> -> vector<32x256xf32>
    %c0_51 = arith.constant 0 : index
    %c0_52 = arith.constant 0 : index
    %81 = vector.load %arg8[%c0_51, %c0_52] : memref<32x1xf32, #tpu.memory_space<vmem>>, vector<32x1xf32>
    %82 = vector.broadcast %81 : vector<32x1xf32> to vector<32x256xf32>
    %83 = arith.addf %80, %82 : vector<32x256xf32>
    %cst_53 = arith.constant 0.000000e+00 : f32
    %84 = vector.broadcast %cst_53 : f32 to vector<32x256xf32>
    %85 = arith.maximumf %83, %84 : vector<32x256xf32>
    %c0_54 = arith.constant 0 : index
    %c0_55 = arith.constant 0 : index
    %86 = vector.load %arg9[%c0_54, %c0_55] : memref<32x32xbf16, #tpu.memory_space<vmem>>, vector<32x32xbf16>
    %87 = arith.truncf %85 : vector<32x256xf32> to vector<32x256xbf16>
    %cst_56 = arith.constant dense<0.000000e+00> : vector<32x256xf32>
    %88 = tpu.matmul %86, %87, %cst_56 {dimension_numbers = #tpu.dot_dimension_numbers<[1], [0], [0], [1], [0, 0, 1, 1], [], []>} : vector<32x32xbf16>, vector<32x256xbf16>, vector<32x256xf32> -> vector<32x256xf32>
    %c0_57 = arith.constant 0 : index
    %c0_58 = arith.constant 0 : index
    %89 = vector.load %arg10[%c0_57, %c0_58] : memref<32x1xf32, #tpu.memory_space<vmem>>, vector<32x1xf32>
    %90 = vector.broadcast %89 : vector<32x1xf32> to vector<32x256xf32>
    %91 = arith.addf %88, %90 : vector<32x256xf32>
    %cst_59 = arith.constant 0.000000e+00 : f32
    %92 = vector.broadcast %cst_59 : f32 to vector<32x256xf32>
    %93 = arith.maximumf %91, %92 : vector<32x256xf32>
    %c0_60 = arith.constant 0 : index
    %c0_61 = arith.constant 0 : index
    %94 = vector.load %arg11[%c0_60, %c0_61] : memref<3x32xbf16, #tpu.memory_space<vmem>>, vector<3x32xbf16>
    %95 = arith.truncf %93 : vector<32x256xf32> to vector<32x256xbf16>
    %cst_62 = arith.constant dense<0.000000e+00> : vector<3x256xf32>
    %96 = tpu.matmul %94, %95, %cst_62 {dimension_numbers = #tpu.dot_dimension_numbers<[1], [0], [0], [1], [0, 0, 1, 1], [], []>} : vector<3x32xbf16>, vector<32x256xbf16>, vector<3x256xf32> -> vector<3x256xf32>
    %c0_63 = arith.constant 0 : index
    %c0_64 = arith.constant 0 : index
    %97 = vector.load %arg12[%c0_63, %c0_64] : memref<3x1xf32, #tpu.memory_space<vmem>>, vector<3x1xf32>
    %98 = vector.broadcast %97 : vector<3x1xf32> to vector<3x256xf32>
    %99 = arith.addf %96, %98 : vector<3x256xf32>
    %cst_65 = arith.constant 0.000000e+00 : f32
    %100 = vector.broadcast %cst_65 : f32 to vector<3x256xf32>
    %101 = arith.subf %100, %99 : vector<3x256xf32>
    %102 = math.exp %101 : vector<3x256xf32>
    %cst_66 = arith.constant 1.000000e+00 : f32
    %103 = vector.broadcast %cst_66 : f32 to vector<3x256xf32>
    %104 = arith.addf %103, %102 : vector<3x256xf32>
    %105 = tpu.reciprocal %104 {approx = true} : vector<3x256xf32> -> vector<3x256xf32>
    %c0_67 = arith.constant 0 : index
    %c0_68 = arith.constant 0 : index
    %106 = vector.load %arg13[%c0_67, %c0_68] : memref<3x256xf32, #tpu.memory_space<vmem>>, vector<3x256xf32>
    tpu.vector_store %arg13[%c0_67, %c0_68], %105 {strides = array<i32>} : memref<3x256xf32, #tpu.memory_space<vmem>>, vector<3x256xf32>,
    return
  }
  func.func @transform_0(%arg0: i32) -> (i32, i32) {
    %c0_i32 = arith.constant 0 : i32
    %c0_i32_0 = arith.constant 0 : i32
    return %c0_i32, %arg0 : i32, i32
  }
  func.func @transform_1(%arg0: i32) -> (i32, i32) {
    %c0_i32 = arith.constant 0 : i32
    %c0_i32_0 = arith.constant 0 : i32
    return %c0_i32, %arg0 : i32, i32
  }
  func.func @transform_2(%arg0: i32) -> (i32, i32) {
    %c0_i32 = arith.constant 0 : i32
    %c0_i32_0 = arith.constant 0 : i32
    %c0_i32_1 = arith.constant 0 : i32
    return %c0_i32, %c0_i32_0 : i32, i32
  }
  func.func @transform_3(%arg0: i32) -> (i32, i32) {
    %c0_i32 = arith.constant 0 : i32
    %c0_i32_0 = arith.constant 0 : i32
    %c0_i32_1 = arith.constant 0 : i32
    return %c0_i32, %c0_i32_0 : i32, i32
  }
  func.func @transform_4(%arg0: i32) -> (i32, i32) {
    %c0_i32 = arith.constant 0 : i32
    %c0_i32_0 = arith.constant 0 : i32
    %c0_i32_1 = arith.constant 0 : i32
    return %c0_i32, %c0_i32_0 : i32, i32
  }
  func.func @transform_5(%arg0: i32) -> (i32, i32) {
    %c0_i32 = arith.constant 0 : i32
    %c0_i32_0 = arith.constant 0 : i32
    %c0_i32_1 = arith.constant 0 : i32
    return %c0_i32, %c0_i32_0 : i32, i32
  }
  func.func @transform_6(%arg0: i32) -> (i32, i32) {
    %c0_i32 = arith.constant 0 : i32
    %c0_i32_0 = arith.constant 0 : i32
    %c0_i32_1 = arith.constant 0 : i32
    return %c0_i32, %c0_i32_0 : i32, i32
  }
  func.func @transform_7(%arg0: i32) -> (i32, i32) {
    %c0_i32 = arith.constant 0 : i32
    %c0_i32_0 = arith.constant 0 : i32
    %c0_i32_1 = arith.constant 0 : i32
    return %c0_i32, %c0_i32_0 : i32, i32
  }
  func.func @transform_8(%arg0: i32) -> (i32, i32) {
    %c0_i32 = arith.constant 0 : i32
    %c0_i32_0 = arith.constant 0 : i32
    %c0_i32_1 = arith.constant 0 : i32
    return %c0_i32, %c0_i32_0 : i32, i32
  }
  func.func @transform_9(%arg0: i32) -> (i32, i32) {
    %c0_i32 = arith.constant 0 : i32
    %c0_i32_0 = arith.constant 0 : i32
    %c0_i32_1 = arith.constant 0 : i32
    return %c0_i32, %c0_i32_0 : i32, i32
  }
  func.func @transform_10(%arg0: i32) -> (i32, i32) {
    %c0_i32 = arith.constant 0 : i32
    %c0_i32_0 = arith.constant 0 : i32
    %c0_i32_1 = arith.constant 0 : i32
    return %c0_i32, %c0_i32_0 : i32, i32
  }
  func.func @transform_11(%arg0: i32) -> (i32, i32) {
    %c0_i32 = arith.constant 0 : i32
    %c0_i32_0 = arith.constant 0 : i32
    %c0_i32_1 = arith.constant 0 : i32
    return %c0_i32, %c0_i32_0 : i32, i32
  }
  func.func @transform_12(%arg0: i32) -> (i32, i32) {
    %c0_i32 = arith.constant 0 : i32
    %c0_i32_0 = arith.constant 0 : i32
    return %c0_i32, %arg0 : i32, i32
  }
}

</mosaic_0001>

<bundles_post_ra>
// kernel: tpu_custom_call.1
= control target key start
LH: loop header
LB: loop body
LE: loop exit
PB: predicated region body
PF: predicated region fallthrough
CT: control target
= control target key end

     0   :  { %s2089_s0 = inlined_call_operand.vmem [shape: f32[3,600], index: 0, kind: input, shape index: {}]   ;;  %s2090_s1 = inlined_call_operand.vmem [shape: bf16[8,600], index: 1, kind: input, shape index: {}]   ;;  %s2091_s2 = inlined_call_operand.vmem [shape: bf16[32,48], index: 2, kind: input, shape index: {}]   ;;  %s2092_s3 = inlined_call_operand.vmem [shape: f32[32,1], index: 3, kind: input, shape index: {}]   ;;  %s2093_s4 = inlined_call_operand.vmem [shape: bf16[32,32], index: 4, kind: input, shape index: {}]   ;;  %s2094_s5 = inlined_call_operand.vmem [shape: f32[32,1], index: 5, kind: input, shape index: {}]   ;;  %s2095_s6 = inlined_call_operand.vmem [shape: bf16[32,32], index: 6, kind: input, shape index: {}]   ;;  %s2096_s7 = inlined_call_operand.vmem [shape: f32[32,1], index: 7, kind: input, shape index: {}]   ;;  %s2097_s8 = inlined_call_operand.vmem [shape: bf16[32,32], index: 8, kind: input, shape index: {}]   ;;  %s2098_s9 = inlined_call_operand.vmem [shape: f32[32,1], index: 9, kind: input, shape index: {}]   ;;  %s2099_s10 = inlined_call_operand.vmem [shape: bf16[3,32], index: 10, kind: input, shape index: {}]   ;;  %s2100_s11 = inlined_call_operand.vmem [shape: f32[3,1], index: 11, kind: input, shape index: {}]   ;;  %s2101_s12 = inlined_call_operand.hbm [shape: f32[3,600], index: 12, kind: output, shape index: {}]  }
   0x1   :  { %2103 = sst [smem:[#allocation6_spill]] %s2089_s0 }
   0x2   :  { %2104 = sst [smem:[#allocation7_spill]] %s2090_s1 }
   0x3   :  { %2105 = sst [smem:[#allocation8_spill]] %s2091_s2 }
   0x4   :  { %2106 = sst [smem:[#allocation9_spill]] %s2092_s3 }
   0x5   :  { %2107 = sst [smem:[#allocation10_spill]] %s2093_s4 }
   0x6   :  { %17 = vsyncpa [#allocation4], 0 }
   0x7   :  { %19 = vsyncpa [#allocation4 + $0x1], 0  ;;  %s1797_s21 = smov 0   ;;  %s1799_s22 = smov 0  }
   0x8   :  { %s1801_s23 = smov 0   ;;  %s1803_s24 = smov 0  }
   0x9 LB: > { %s1818_s25 = sadd.s32 4294967295, %s1721_s24   ;;  %s1503_s26 = sadd.s32 4294967294, %s1721_s24   ;;  %s1721_s24 = sphi %s1803_s24, %s2120_s24   ;;  %s1717_s23 = sphi %s1801_s23, %s2119_s23   ;;  %s1713_s22 = sphi %s1799_s22, %s2118_s22   ;;  %s1709_s21 = sphi %s1797_s21, %s2117_s21  }
   0xa   : > { %s1822_s27 = sadd.s32 1, %s1721_s24   ;;  %s294_s28 = sadd.s32 1, %s1717_s23 }
   0xb   : > { %s291_s29 = ssub.s32 %s1721_s24, %s1822_s27  ;;  %p304_p0 = scmp.ne.s32.totalorder %s1717_s23, %s1713_s22 }
   0xc   : > { %p292_p1 = scmp.eq.s32.totalorder %s291_s29, 0  ;;  %p305_p2 = scmp.eq.s32.totalorder %s1818_s25, 2 }
   0xd   : > { %p310_p3 = scmp.ne.s32.totalorder %s1713_s22, %s1709_s21  ;;  %p311_p4 = scmp.eq.s32.totalorder %s1503_s26, 2 }
   0xe   : > { %s1833_s30 = scalar_select %p292_p1, %s1717_s23, %s294_s28  }
   0xf   : > { %p1835_p5 = por %p305_p2, %p304_p0  ;;  %p1839_p6 = por %p311_p4, %p310_p3 }
  0x10   : > { %p1506_p7 = scmp.ge.s32.totalorder %s1721_s24, 1  ;;  %p393_p8 = scmp.lt.s32.totalorder %s1721_s24, 4 }
  0x12   : > { %p394_p9 = pnand %p1506_p7, %p393_p8 }
  0x13   : > { %s1846_s15 = sshll.u32 (!%p394_p9), %s1818_s25, 1  ;;  %s2110_s0 = sld [smem:[#allocation6_spill]] (!%p394_p9) }
  0x14   : > { %397 = sbr.rel (%p394_p9) target bundleno = 1098 (0x44a), region = 68  ;;  %p453_p10 = scmp.lt.s32.totalorder (!%p394_p9), %s1846_s15, 4 }
  0x15   : > { %s2111_s3 = sld [smem:[#allocation9_spill]] (!%p394_p9) }
  0x16   : > { %s2112_s1 = sld [smem:[#allocation7_spill]] (!%p394_p9) }
  0x17   : > { %s2113_s2 = sld [smem:[#allocation8_spill]] (!%p394_p9) }
  0x18   : > { %s2114_s4 = sld [smem:[#allocation10_spill]] (!%p394_p9) }
  0x19   : > { %v1723_v0 = vmov 0   ;;  %s1853_s16 = scalar_select %p453_p10, %s1846_s15, 4  ;;  %v1724_v15 = vmov 683565275   ;;  %v1725_v17 = vmov 2475754826  }
  0x1a   : > { %1637 = vset.pattern.permute.xlu0 %v1723_v0  ;;  %1638 = vset.pattern.permute.xlu1 %v1723_v0  ;;  %v1726_v19 = vmov 2131351028   ;;  %v1727_v21 = vmov 2102212464   ;;  %v1728_v23 = vmov 920167782  }
  0x1b   : > { %1639 = vset.pattern.permute.xlu2 %v1723_v0  ;;  %s1509_s17 = sshll.u32 %s1853_s16, 2  ;;  %v1729_v29 = vmov 1326507024   ;;  %s1417_s28 = ssub.s32 (%p1835_p5), 5, %s1846_s15 }
  0x1c   : > { %s456_s20 = scalar_lea.vmem %s2110_s0, %s1509_s17  ;;  %s470_s29 = scalar_lea.vmem %s2112_s1, %s1509_s17 }
  0x1d   : > { %v1861_v1 = vld [vmem:[%s456_s20] sm:$0x77]  ;;  %s445_s0 = sand.u32 1, %s1713_s22   ;;  %p1418_p11 = scmp.lt.s32.totalorder (%p1835_p5), %s1417_s28, 2 }
  0x1e   : > { %489 = vst [vmem:[#allocation1] ss:$2 sm:$0xff] %v1861_v1  ;;  %v499_v2 = vand.u32 2139095040, %v1861_v1  ;;  %v496_v4 = vand.u32 2147483647, %v1861_v1  ;;  %vm498_vm12 = vcmp.lt.s32.totalorder %v1861_v1, 0 }
  0x1f   : > { %s1507_s19 = sshll.u32 %s445_s0, 3  ;;  %s2034_s26 = scalar_lea.sflag [#allocation4], %s445_s0 }
  0x20   : > { %v500_v3 = vshrl.u32 %v499_v2, 23  ;;  %v503_v8 = vand.u32 8388607, %v496_v4  ;;  %vm497_vm13 = vcmp.le.f32.partialorder %v496_v4, 0.7853982  ;;  %s447_s20 = scalar_lea.vmem [#allocation3], %s1507_s19 }
  0x22   : > { %v1512_v5 = vadd.s32 4294967169, %v500_v3  ;;  %v504_v12 = vor.u32 8388608, %v503_v8 }
  0x24   : > { %v506_v6 = vadd.s32 1, %v1512_v5  ;;  %v1871_v31 = vshll.u32 %v504_v12, 8 }
  0x25   : > { %v490_v7 = vld.sshfl [vmem:[#allocation1] sm:$0xff pattern:$0x75316420]  ;;  %v491_v9 = vld.sshfl [vmem:[#allocation1 + $0x8] sm:$0xff pattern:$0x75316420] }
  0x26   : > { %vm507_vm0 = vcmp.gt.s32.totalorder %v506_v6, 0  ;;  %494 = vst [vmem:[#allocation2 + $0x10] sm:$0x7] %v490_v7  ;;  %v545_v43 = vand.u32 65535, %v1871_v31  ;;  %v546_v44 = vshrl.u32 %v1871_v31, 16 }
  0x27   : > { %v508_v10 = vsel %vm507_vm0, %v506_v6, 0  ;;  %495 = vst [vmem:[#allocation2 + $0x18] sm:$0x7] %v491_v9 }
  0x28   : > { %v510_v11 = vand.u32 31, %v508_v10  ;;  %v1868_v13 = vshrl.u32 %v508_v10, 5 }
  0x2a   : > { %v511_v14 = vsub.s32 32, %v510_v11  ;;  %v513_v16 = vshll.u32 %v1724_v15, %v510_v11  ;;  %v516_v18 = vshll.u32 %v1725_v17, %v510_v11  ;;  %v519_v20 = vshll.u32 %v1726_v19, %v510_v11 }
  0x2b   : > { %v522_v22 = vshll.u32 %v1727_v21, %v510_v11  ;;  %v525_v24 = vshll.u32 %v1728_v23, %v510_v11  ;;  %vm528_vm1 = vcmp.lt.s32.totalorder %v1868_v13, 1  ;;  %vm531_vm2 = vcmp.lt.s32.totalorder %v1868_v13, 4 }
  0x2c   : > { %v514_v25 = vshrl.u32 %v1725_v17, %v511_v14  ;;  %v517_v26 = vshrl.u32 %v1726_v19, %v511_v14  ;;  %v520_v27 = vshrl.u32 %v1727_v21, %v511_v14  ;;  %v523_v28 = vshrl.u32 %v1728_v23, %v511_v14 }
  0x2d   : > { %v526_v30 = vshrl.u32 %v1729_v29, %v511_v14  ;;  %vm530_vm3 = vcmp.lt.s32.totalorder %v1868_v13, 3  ;;  %vm529_vm4 = vcmp.lt.s32.totalorder %v1868_v13, 2  ;;  %v512_v51 = vshrl.u32 %v1724_v15, %v511_v14 }
  0x2e   : > { %v515_v32 = vor.u32 %v514_v25, %v513_v16  ;;  %v518_v33 = vor.u32 %v517_v26, %v516_v18  ;;  %v521_v34 = vor.u32 %v520_v27, %v519_v20  ;;  %v524_v35 = vor.u32 %v523_v28, %v522_v22 }
  0x2f   : > { %v527_v36 = vor.u32 %v526_v30, %v525_v24 }
  0x30   : > { %v536_v37 = vsel %vm528_vm1, %v515_v32, %v518_v33  ;;  %v540_v38 = vsel %vm528_vm1, %v518_v33, %v521_v34  ;;  %v537_v39 = vsel %vm531_vm2, %v524_v35, 920167782  ;;  %v532_v2 = vsel %vm528_vm1, %v512_v51, %v515_v32 }
  0x31   : > { %v541_v40 = vsel %vm531_vm2, %v527_v36, 1326507024  ;;  %v538_v41 = vsel %vm530_vm3, %v521_v34, %v537_v39  ;;  %v533_v5 = vsel %vm531_vm2, %v521_v34, 2102212464  ;;  %vm639_vm1 = vweird.f32 %v1861_v1 }
  0x32   : > { %v542_v42 = vsel %vm530_vm3, %v524_v35, %v541_v40  ;;  %v539_v45 = vsel %vm529_vm4, %v536_v37, %v538_v41  ;;  %v534_v15 = vsel %vm530_vm3, %v518_v33, %v533_v5 }
  0x33   : > { %v543_v46 = vsel %vm529_vm4, %v540_v38, %v542_v42  ;;  %v569_v49 = vand.u32 65535, %v539_v45  ;;  %v570_v50 = vshrl.u32 %v539_v45, 16  ;;  %v535_v23 = vsel %vm529_vm4, %v532_v2, %v534_v15  ;;  %v983_v15 = vld [vmem:[%s2111_s3 + $0x10] sm:$0xff] }
  0x34   : > { %v547_v47 = vand.u32 65535, %v543_v46  ;;  %v548_v48 = vshrl.u32 %v543_v46, 16  ;;  %v589_v27 = vmul.u32 %v1871_v31, %v535_v23  ;;  %997 = vperm.xlu0 %1637, %v983_v15   ;;  %v984_v15 = vld [vmem:[%s2111_s3 + $0x18] sm:$0xff] }
  0x35   : > { %v571_v55 = vmul.u32 %v569_v49, %v545_v43  ;;  %v572_v56 = vmul.u32 %v570_v50, %v545_v43  ;;  %v573_v57 = vmul.u32 %v569_v49, %v546_v44  ;;  %v574_v61 = vmul.u32 %v570_v50, %v546_v44 }
  0x36   : > { %v549_v52 = vmul.u32 %v547_v47, %v545_v43  ;;  %v550_v53 = vmul.u32 %v548_v48, %v545_v43  ;;  %v551_v54 = vmul.u32 %v547_v47, %v546_v44  ;;  %v552_v58 = vmul.u32 %v548_v48, %v546_v44 }
  0x37   : > { %v575_v62 = vshll.u32 %v572_v56, 16  ;;  %v577_v63 = vshll.u32 %v573_v57, 16  ;;  %v576_v12 = vshrl.u32 %v572_v56, 16  ;;  %v578_v19 = vshrl.u32 %v573_v57, 16 }
  0x38   : > { %v553_v59 = vshll.u32 %v550_v53, 16  ;;  %v555_v60 = vshll.u32 %v551_v54, 16  ;;  %v554_v8 = vshrl.u32 %v550_v53, 16  ;;  %v556_v16 = vshrl.u32 %v551_v54, 16 }
  0x39   : > { %vm579_vm6 = vc.u32 %v571_v55, %v575_v62  ;;  %v581_v7 = vadd.s32 %v575_v62, %v571_v55 }
  0x3a   : > { %vm557_vm5 = vc.u32 %v549_v52, %v553_v59  ;;  %v559_v3 = vadd.s32 %v553_v59, %v549_v52  ;;  %v580_v10 = vsel %vm579_vm6, 1, %v1723_v0  ;;  %vm1015_vm6 = vcmask 392192  }
  0x3b   : > { %v558_v6 = vsel %vm557_vm5, 1, %v1723_v0  ;;  %v582_v14 = vadd.s32 %v580_v10, %v574_v61  ;;  %vm583_vm8 = vc.u32 %v581_v7, %v577_v63  ;;  %v585_v22 = vadd.s32 %v581_v7, %v577_v63 }
  0x3c   : > { %v560_v9 = vadd.s32 %v558_v6, %v552_v58  ;;  %vm561_vm7 = vc.u32 %v559_v3, %v555_v60  ;;  %v584_v18 = vsel %vm583_vm8, 1, %v1723_v0  ;;  %1002 = vperm.xlu0 %1637, %v984_v15   ;;  %vm1404_vm8 = vcmask 1043456  }
  0x3d   : > { %v562_v11 = vsel %vm561_vm7, 1, %v1723_v0  ;;  %v586_v20 = vadd.s32 %v584_v18, %v582_v14  ;;  %vm1110_vm7 = vcmask 261120  }
  0x3e   : > { %v564_v17 = vadd.s32 %v562_v11, %v560_v9 }
  0x3f   : > { %v587_v24 = vadd.s32 %v586_v20, %v576_v12 }
  0x40   : > { %v565_v21 = vadd.s32 %v564_v17, %v554_v8 }
  0x41   : > { %v588_v26 = vadd.s32 %v587_v24, %v578_v19 }
  0x42   : > { %v566_v25 = vadd.s32 %v565_v21, %v556_v16 }
  0x43   : > { %v592_v28 = vadd.s32 1, %v588_v26 }
  0x44   : > { %vm591_vm9 = vc.u32 %v566_v25, %v585_v22  ;;  %v590_v13 = vadd.s32 %v585_v22, %v566_v25 }
  0x45   : > { %v593_v29 = vsel %vm591_vm9, %v592_v28, %v588_v26 }
  0x46   : > { %v594_v30 = vadd.s32 %v593_v29, %v589_v27 }
  0x48   : > { %v595_v32 = vadd.s32 536870912, %v594_v30 }
  0x4a   : > { %v596_v33 = vshrl.u32 %v595_v32, 30 }
  0x4c   : > { %v597_v34 = vshll.u32 %v596_v33, 30  ;;  %v620_v50 = vsub.s32 4, %v596_v33 }
  0x4e   : > { %v598_v0 = vsub.s32 %v594_v30, %v597_v34  ;;  %v621_v53 = vsel %vm498_vm12, %v620_v50, %v596_v33 }
  0x4f   : > { %v623_v56 = vsel %vm497_vm13, 0, %v621_v53 }
  0x50   : > { %vm599_vm10 = vcmp.lt.s32.totalorder %v598_v0, 0  ;;  %v600_v35 = vsub.s32 0, %v598_v0  ;;  %v640_v61 = vadd.s32 3, %v623_v56  ;;  %v795_v9 = vand.u32 3, %v623_v56 }
  0x51   : > { %v1730_v56 = vmov 0.0  }
  0x52   : > { %v601_v36 = vsel %vm599_vm10, %v600_v35, %v598_v0  ;;  %v641_v5 = vand.u32 3, %v640_v61  ;;  %vm797_vm2 = vcmp.eq.s32.totalorder %v795_v9, 0  ;;  %vm800_vm3 = vcmp.eq.s32.totalorder %v795_v9, 2 }
  0x53   : > { %v602_v37 = vclz %v601_v36  ;;  %vm796_vm4 = vcmp.lt.s32.totalorder %v795_v9, 2 }
  0x54   : > { %vm646_vm14 = vcmp.eq.s32.totalorder %v641_v5, 2  ;;  %vm643_vm15 = vcmp.eq.s32.totalorder %v641_v5, 0  ;;  %vm642_vm0 = vcmp.lt.s32.totalorder %v641_v5, 2 }
  0x55   : > { %v1513_v38 = vadd.s32 4294967294, %v602_v37 }
  0x57   : > { %vm1514_vm11 = vcmp.lt.s32.totalorder %v1513_v38, 0 }
  0x58   : > { %v605_v39 = vsel %vm1514_vm11, 0, %v1513_v38 }
  0x59   : > { %v606_v40 = vsub.s32 32, %v605_v39  ;;  %v607_v41 = vshll.u32 %v598_v0, %v605_v39  ;;  %v610_v42 = vsub.s32 4294967266, %v605_v39 }
  0x5b   : > { %v608_v31 = vshrl.u32 %v590_v13, %v606_v40  ;;  %v611_v43 = vadd.s32 127, %v610_v42 }
  0x5d   : > { %v609_v44 = vor.u32 %v608_v31, %v607_v41  ;;  %v612_v45 = vshll.u32 %v611_v43, 23 }
  0x5f   : > { %v613_v46 = vor.u32 4788187, %v612_v45  ;;  %v616_v47 = vcvt.s32.f32 %v609_v44 }
  0x61   : > { %v614_v48 = vand.u32 2147483647, %v613_v46 }
  0x63   : > { %v617_v49 = vmul.f32 %v616_v47, %v614_v48 }
  0x65   : > { %v618_v51 = vxor.u32 2147483648, %v617_v49 }
  0x67   : > { %v619_v52 = vsel %vm498_vm12, %v618_v51, %v617_v49 }
  0x68   : > { %v622_v54 = vsel %vm497_vm13, %v1861_v1, %v619_v52  ;;  %v952_v52 = vlaneseq }
  0x69   : > { %v624_v55 = vmul.f32 %v622_v54, %v622_v54 }
  0x6a   : > { %vm954_vm5 = vcmp.lt.s32.totalorder %v952_v52, 256  ;;  %v1266_v52 = vld [vmem:[%s2098_s9 + $0x8] sm:$0xff] }
  0x6b   : > { %v625_v57 = vmul.f32 -0.001358992, %v624_v55  ;;  %v632_v58 = vmul.f32 -0.00019511016, %v624_v55 }
  0x6c   : > { %957 = vst.msk [vmem:[#allocation2 + $0x57] ss:$8 sm:$0x3] %vm954_vm5, %v1730_v56  ;;  %v1583_v56 = vld [vmem:[%s2113_s2 + $0x8] sm:$0xff] }
  0x6d   : > { %v626_v59 = vadd.f32 0.041655596, %v625_v57  ;;  %v633_v60 = vadd.f32 0.008332121, %v632_v58 }
  0x6f   : > { %v627_v62 = vmul.f32 %v626_v59, %v624_v55  ;;  %v634_v63 = vmul.f32 %v633_v60, %v624_v55 }
  0x71   : > { %v628_v2 = vadd.f32 -0.4999988, %v627_v62  ;;  %v635_v3 = vadd.f32 -0.16666654, %v634_v63 }
  0x73   : > { %v629_v6 = vmul.f32 %v628_v2, %v624_v55  ;;  %v636_v7 = vmul.f32 %v635_v3, %v624_v55 }
  0x75   : > { %v630_v4 = vadd.f32 1.0, %v629_v6  ;;  %v637_v8 = vadd.f32 1.0, %v636_v7  ;;  %v981_v7 = vld [vmem:[%s2111_s3] sm:$0xff] }
  0x76   : > { %987 = vperm.xlu1 %1638, %v981_v7  }
  0x77   : > { %v638_v10 = vmul.f32 %v637_v8, %v622_v54  ;;  %v647_v11 = vxor.u32 2147483648, %v630_v4 }
  0x79   : > { %v644_v12 = vxor.u32 2147483648, %v638_v10  ;;  %v648_v14 = vsel %vm646_vm14, %v647_v11, %v638_v10  ;;  %v802_v20 = vsel %vm800_vm3, %v647_v11, %v638_v10 }
  0x7b   : > { %v645_v16 = vsel %vm643_vm15, %v630_v4, %v644_v12  ;;  %v799_v19 = vsel %vm797_vm2, %v630_v4, %v644_v12 }
  0x7c   : > { %v649_v17 = vsel %vm642_vm0, %v645_v16, %v648_v14  ;;  %v803_v21 = vsel %vm796_vm4, %v799_v19, %v802_v20  ;;  %v1076_v20 = vld [vmem:[%s2094_s5] sm:$0xff] }
  0x7d   : > { %v650_v18 = vsel %vm639_vm1, nan, %v649_v17  ;;  %v804_v22 = vsel %vm639_vm1, nan, %v803_v21  ;;  %v982_v17 = vld [vmem:[%s2111_s3 + $0x8] sm:$0xff]  ;;  %1082 = vperm.xlu0 %1637, %v1076_v20  }
  0x7e   : > { %806 = vst [vmem:[#allocation1] ss:$2 sm:$0xff] %v650_v18  ;;  %v827_v1 = vmul.f32 2.0, %v650_v18  ;;  %v829_v26 = vmul.f32 2.0, %v804_v22  ;;  %992 = vperm.xlu1 %1638, %v982_v17  }
  0x80   : > { %v828_v25 = vmul.f32 %v827_v1, %v804_v22  ;;  %v830_v29 = vmul.f32 %v829_v26, %v804_v22 }
  0x82   : > { %v1518_v30 = vadd.f32 -1.0, %v830_v29  ;;  %v851_v34 = vmul.f32 2.0, %v828_v25 }
  0x84   : > { %v852_v0 = vmul.f32 %v1518_v30, %v851_v34  ;;  %v853_v35 = vmul.f32 2.0, %v1518_v30 }
  0x85   : > { %v1915_v23 = vld.sshfl [vmem:[#allocation1] sm:$0xff pattern:$0x75316420]  ;;  %v1917_v24 = vld.sshfl [vmem:[#allocation1 + $0x8] sm:$0xff pattern:$0x75316420] }
  0x86   : > { %816 = vst [vmem:[#allocation1] ss:$2 sm:$0xff] %v804_v22  ;;  %v854_v38 = vmul.f32 %v1518_v30, %v853_v35  ;;  %v878_v41 = vmul.f32 2.0, %v852_v0  ;;  %v1171_v35 = vld [vmem:[%s2096_s7] sm:$0xff] }
  0x88   : > { %v1519_v13 = vadd.f32 -1.0, %v854_v38 }
  0x8a   : > { %v879_v42 = vmul.f32 %v1519_v13, %v878_v41  ;;  %v880_v31 = vmul.f32 2.0, %v1519_v13 }
  0x8c   : > { %v881_v45 = vmul.f32 %v1519_v13, %v880_v31  ;;  %v901_v49 = vmul.f32 2.0, %v879_v42 }
  0x8d   : > { %v1919_v27 = vld.sshfl [vmem:[#allocation1] sm:$0xff pattern:$0x75316420]  ;;  %v1921_v28 = vld.sshfl [vmem:[#allocation1 + $0x8] sm:$0xff pattern:$0x75316420] }
  0x8e   : > { %833 = vst [vmem:[#allocation1] ss:$2 sm:$0xff] %v828_v25  ;;  %v1520_v46 = vadd.f32 -1.0, %v881_v45  ;;  %v819_v57 = vrot.slane %v1919_v27, 2  ;;  %v820_v16 = vrot.slane %v1921_v28, 2  ;;  %v1077_v27 = vld [vmem:[%s2094_s5 + $0x8] sm:$0xff] }
  0x8f   : > { %1087 = vperm.xlu1 %1638, %v1077_v27  }
  0x90   : > { %v902_v50 = vmul.f32 %v1520_v46, %v901_v49  ;;  %v903_v51 = vmul.f32 2.0, %v1520_v46  ;;  %825 = vst [vmem:[#allocation2 + $0x20] sm:$0x1] %v819_v57 }
  0x91   : > { %823 = vst [vmem:[#allocation2 + $0x10] sm:$0xc0] %v819_v57 }
  0x92   : > { %v904_v55 = vmul.f32 %v1520_v46, %v903_v51  ;;  %v928_v63 = vmul.f32 2.0, %v902_v50  ;;  %826 = vst [vmem:[#allocation2 + $0x28] sm:$0x1] %v820_v16 }
  0x93   : > { %824 = vst [vmem:[#allocation2 + $0x18] sm:$0xc0] %v820_v16 }
  0x94   : > { %v1521_v59 = vadd.f32 -1.0, %v904_v55  ;;  %v1356_v55 = vld [vmem:[%s2100_s11] sm:$0x7] }
  0x95   : > { %v834_v32 = vld.sshfl [vmem:[#allocation1] sm:$0xff pattern:$0x75316420]  ;;  %v1923_v33 = vld.sshfl [vmem:[#allocation1 + $0x8] sm:$0xff pattern:$0x75316420] }
  0x96   : > { %844 = vst [vmem:[#allocation1 + $0x1] ss:$2 sm:$0xff] %v1518_v30  ;;  %v836_v58 = vrot.slane %v834_v32, 7  ;;  %v929_v4 = vmul.f32 %v1521_v59, %v928_v63  ;;  %v930_v8 = vmul.f32 2.0, %v1521_v59  ;;  %v837_v19 = vrot.slane %v1923_v33, 7  ;;  %v483_v30 = vld [vmem:[%s470_s29] sm:$0xff] }
  0x97   : > { %v1174_v32 = vld [vmem:[%s2096_s7 + $0x18] sm:$0xff]  ;;  %v485_v38 = vunpack.c.h.bf16 %v483_v30  ;;  %1177 = vperm.xlu1 %1638, %v1171_v35   ;;  %v1265_v35 = vld [vmem:[%s2098_s9] sm:$0xff] }
  0x98   : > { %840 = vst [vmem:[#allocation2 + $0x20] sm:$0xe] %v836_v58  ;;  %v931_v11 = vmul.f32 %v1521_v59, %v930_v8  ;;  %1192 = vperm.xlu0 %1637, %v1174_v32   ;;  %v1584_v32 = vld [vmem:[%s2114_s4] sm:$0xff] }
  0x99   : > { %841 = vst [vmem:[#allocation2 + $0x28] sm:$0xe] %v837_v19 }
  0x9a   : > { %v1522_v18 = vadd.f32 -1.0, %v931_v11 }
  0x9d   : > { %v845_v36 = vld.sshfl [vmem:[#allocation1] sm:$0xff pattern:$0x75316420]  ;;  %v846_v37 = vld.sshfl [vmem:[#allocation1 + $0x8] sm:$0xff pattern:$0x75316420] }
  0x9e   : > { %857 = vst [vmem:[#allocation1] ss:$2 sm:$0xff] %v852_v0  ;;  %v809_v0 = vrot.slane %v1915_v23, 5 }
  0x9f   : > { %849 = vst [vmem:[#allocation2 + $0x20] sm:$0x70] %v845_v36  ;;  %v484_v36 = vunpack.c.l.bf16 %v483_v30 }
  0xa0   : > { %850 = vst [vmem:[#allocation2 + $0x28] sm:$0x70] %v846_v37  ;;  %v810_v37 = vrot.slane %v1917_v24, 5  ;;  %v1268_v24 = vld [vmem:[%s2098_s9 + $0x18] sm:$0xff] }
  0xa1   : > { %813 = vst [vmem:[#allocation2 + $0x10] sm:$0x38] %v809_v0  ;;  %1286 = vperm.xlu1 %1638, %v1268_v24   ;;  %v1585_v0 = vld [vmem:[%s2114_s4 + $0x8] sm:$0xff] }
  0xa2   : > { %814 = vst [vmem:[#allocation2 + $0x18] sm:$0x38] %v810_v37 }
  0xa5   : > { %v858_v39 = vld.sshfl [vmem:[#allocation1] sm:$0xff pattern:$0x75316420]  ;;  %v1925_v40 = vld.sshfl [vmem:[#allocation1 + $0x8] sm:$0xff pattern:$0x75316420] }
  0xa6   : > { %869 = vst [vmem:[#allocation1] ss:$2 sm:$0xff] %v1519_v13  ;;  %v860_v60 = vrot.slane %v858_v39, 1  ;;  %v861_v26 = vrot.slane %v1925_v40, 1  ;;  %v1267_v40 = vld [vmem:[%s2098_s9 + $0x10] sm:$0xff] }
  0xa7   : > { %1281 = vperm.xlu0 %1637, %v1267_v40  }
  0xa8   : > { %864 = vst [vmem:[#allocation2 + $0x20] sm:$0x80] %v860_v60  ;;  %v965_v49 = vld [vmem:[#allocation2 + $0x10] sm:$0xff] }
  0xa9   : > { %866 = vst [vmem:[#allocation2 + $0x30] sm:$0x3] %v860_v60  ;;  %v966_v51 = vld [vmem:[#allocation2 + $0x18] sm:$0xff]  ;;  %1359 = vperm.xlu1 %1638, %v1356_v55  }
  0xaa   : > { %865 = vst [vmem:[#allocation2 + $0x28] sm:$0x80] %v861_v26 }
  0xab   : > { %867 = vst [vmem:[#allocation2 + $0x38] sm:$0x3] %v861_v26 }
  0xad   : > { %v870_v43 = vld.sshfl [vmem:[#allocation1] sm:$0xff pattern:$0x75316420]  ;;  %v1927_v44 = vld.sshfl [vmem:[#allocation1 + $0x8] sm:$0xff pattern:$0x75316420] }
  0xae   : > { %884 = vst [vmem:[#allocation1] ss:$2 sm:$0xff] %v879_v42  ;;  %v872_v5 = vrot.slane %v870_v43, 6  ;;  %v873_v28 = vrot.slane %v1927_v44, 6 }
  0xaf   : > { %v967_v41 = vld [vmem:[#allocation2 + $0x20] sm:$0xff]  ;;  %1276 = vperm.xlu0 %1637, %v1266_v52  }
  0xb0   : > { %876 = vst [vmem:[#allocation2 + $0x30] sm:$0x1c] %v872_v5 }
  0xb1   : > { %877 = vst [vmem:[#allocation2 + $0x38] sm:$0x1c] %v873_v28  ;;  %v968_v44 = vld [vmem:[#allocation2 + $0x28] sm:$0xff] }
  0xb5   : > { %v885_v47 = vld.sshfl [vmem:[#allocation1] sm:$0xff pattern:$0x75316420]  ;;  %v1929_v48 = vld.sshfl [vmem:[#allocation1 + $0x8] sm:$0xff pattern:$0x75316420] }
  0xb6   : > { %894 = vst [vmem:[#allocation1] ss:$2 sm:$0xff] %v1520_v46  ;;  %v887_v6 = vrot.slane %v885_v47, 3  ;;  %v888_v29 = vrot.slane %v1929_v48, 3 }
  0xb8   : > { %891 = vst [vmem:[#allocation2 + $0x30] sm:$0xe0] %v887_v6  ;;  %v1078_v6 = vld [vmem:[%s2094_s5 + $0x10] sm:$0xff] }
  0xb9   : > { %892 = vst [vmem:[#allocation2 + $0x38] sm:$0xe0] %v888_v29  ;;  %1092 = vperm.xlu2 %1639, %v1078_v6  }
  0xbd   : > { %v895_v53 = vld.sshfl [vmem:[#allocation1] sm:$0xff pattern:$0x75316420]  ;;  %v896_v54 = vld.sshfl [vmem:[#allocation1 + $0x8] sm:$0xff pattern:$0x75316420] }
  0xbe   : > { %899 = vst [vmem:[#allocation2 + $0x40] sm:$0x7] %v895_v53  ;;  %v976_v53 = vpack.c.bf16 %v966_v51, %v485_v38 }
  0xbf   : > { %907 = vst [vmem:[#allocation1] ss:$2 sm:$0xff] %v902_v50  ;;  %v969_v42 = vld [vmem:[#allocation2 + $0x30] sm:$0xff]  ;;  %v975_v50 = vpack.c.bf16 %v965_v49, %v484_v36 }
  0xc0   : > { %900 = vst [vmem:[#allocation2 + $0x48] sm:$0x7] %v896_v54  ;;  %v970_v46 = vld [vmem:[#allocation2 + $0x38] sm:$0xff]  ;;  %v977_v47 = vpack.c.bf16 %v969_v42, %v967_v41 }
  0xc1   : > { %v978_v48 = vpack.c.bf16 %v970_v46, %v968_v44  ;;  %v1582_v54 = vld [vmem:[%s2113_s2] sm:$0xff] }
  0xc6   : > { %v908_v61 = vld.sshfl [vmem:[#allocation1] sm:$0xff pattern:$0x75316420]  ;;  %v909_v62 = vld.sshfl [vmem:[#allocation1 + $0x8] sm:$0xff pattern:$0x75316420] }
  0xc7   : > { %v910_v2 = vrot.slane %v908_v61, 5  ;;  %917 = vst [vmem:[#allocation1] ss:$2 sm:$0xff] %v1521_v59  ;;  %v911_v3 = vrot.slane %v909_v62, 5  ;;  %v998_v61 = vpop.permute.xlu0 %997 }
  0xc9   : > { %914 = vst [vmem:[#allocation2 + $0x40] sm:$0x38] %v910_v2 }
  0xca   : > { %915 = vst [vmem:[#allocation2 + $0x48] sm:$0x38] %v911_v3 }
  0xce   : > { %v918_v9 = vld.sshfl [vmem:[#allocation1] sm:$0xff pattern:$0x75316420]  ;;  %v919_v10 = vld.sshfl [vmem:[#allocation1 + $0x8] sm:$0xff pattern:$0x75316420] }
  0xcf   : > { %v920_v12 = vrot.slane %v918_v9, 2  ;;  %934 = vst [vmem:[#allocation1] ss:$2 sm:$0xff] %v929_v4  ;;  %v921_v14 = vrot.slane %v919_v10, 2  ;;  %v1003_v3 = vpop.permute.xlu0 %1002 }
  0xd1   : > { %924 = vst [vmem:[#allocation2 + $0x40] sm:$0xc0] %v920_v12 }
  0xd2   : > { %926 = vst [vmem:[#allocation2 + $0x50] sm:$0x1] %v920_v12 }
  0xd3   : > { %925 = vst [vmem:[#allocation2 + $0x48] sm:$0xc0] %v921_v14 }
  0xd4   : > { %927 = vst [vmem:[#allocation2 + $0x58] sm:$0x1] %v921_v14 }
  0xd6   : > { %v935_v21 = vld.sshfl [vmem:[#allocation1] sm:$0xff pattern:$0x75316420]  ;;  %v936_v22 = vld.sshfl [vmem:[#allocation1 + $0x8] sm:$0xff pattern:$0x75316420] }
  0xd7   : > { %v937_v1 = vrot.slane %v935_v21, 7  ;;  %945 = vst [vmem:[#allocation1 + $0x1] ss:$2 sm:$0xff] %v1522_v18  ;;  %v938_v25 = vrot.slane %v936_v22, 7 }
  0xd8   : > { %v971_v13 = vld [vmem:[#allocation2 + $0x40] sm:$0xff] }
  0xd9   : > { %941 = vst [vmem:[#allocation2 + $0x50] sm:$0xe] %v937_v1  ;;  %v1079_v1 = vld [vmem:[%s2094_s5 + $0x18] sm:$0xff] }
  0xda   : > { %942 = vst [vmem:[#allocation2 + $0x58] sm:$0xe] %v938_v25  ;;  %v972_v39 = vld [vmem:[#allocation2 + $0x48] sm:$0xff]  ;;  %1097 = vperm.xlu2 %1639, %v1079_v1  }
  0xde   : > { %v946_v33 = vld.sshfl [vmem:[#allocation1] sm:$0xff pattern:$0x75316420]  ;;  %v947_v34 = vld.sshfl [vmem:[#allocation1 + $0x8] sm:$0xff pattern:$0x75316420] }
  0xdf   : > { %950 = vst [vmem:[#allocation2 + $0x50] sm:$0x70] %v946_v33  ;;  %v1173_v33 = vld [vmem:[%s2096_s7 + $0x10] sm:$0xff] }
  0xe0   : > { %951 = vst [vmem:[#allocation2 + $0x58] sm:$0x70] %v947_v34  ;;  %v1172_v34 = vld [vmem:[%s2096_s7 + $0x8] sm:$0xff] }
  0xe2   : > { %1187 = vperm.xlu2 %1639, %v1173_v33  }
  0xe6   : > { %v973_v23 = vld [vmem:[#allocation2 + $0x50] sm:$0xff] }
  0xe7   : > { %v979_v31 = vpack.c.bf16 %v973_v23, %v971_v13  ;;  %v974_v43 = vld [vmem:[#allocation2 + $0x58] sm:$0xff] }
  0xe8   : > { %v980_v45 = vpack.c.bf16 %v974_v43, %v972_v39  ;;  %v988_v62 = vpop.permute.xlu1 %987 }
  0xe9   : > { %1027 = vmatpush.bf16.msra.mxu0 %v979_v31 }
  0xea   : > { %1046 = vmatpush.bf16.msra.mxu1 %v980_v45  ;;  %1182 = vperm.xlu2 %1639, %v1172_v34  }
  0xed   : > { %1028 = vmatpush.bf16.msra.mxu0 %v977_v47 }
  0xee   : > { %1047 = vmatpush.bf16.msra.mxu1 %v978_v48 }
  0xef   : > { %v1083_v47 = vpop.permute.xlu0 %1082 }
  0xf0   : > { %v993_v7 = vpop.permute.xlu1 %992 }
  0xf1   : > { %1029 = vmatpush.bf16.msra.mxu0 %v975_v50 }
  0xf2   : > { %1048 = vmatpush.bf16.msra.mxu1 %v976_v53  ;;  %1271 = vperm.xlu2 %1639, %v1265_v35  }
  0xf4   : > { %1531 = vmatmul.msk.bf16.vlgmr.msra.gmra.mxu0 %vm1015_vm6, %v1582_v54 }
  0xf5   : > { %1533 = vmatmul.msk.bf16.vlgmr.msra.gmra.mxu1 %vm1015_vm6, %v1582_v54 }
 0x101   : > { %v1088_v41 = vpop.permute.xlu1 %1087 }
 0x104   : > { %1532 = vmatmul.msk.bf16.gmra.mxu0 %vm1015_vm6, %v1583_v56 }
 0x105   : > { %1534 = vmatmul.msk.bf16.gmra.mxu1 %vm1015_vm6, %v1583_v56 }
 0x113   : > { %v1093_v39 = vpop.permute.xlu2 %1092 }
 0x134   : > { %v1098_v31 = vpop.permute.xlu2 %1097 }
 0x171   : > { %v1031_v57 = vpop.f32.mrf.mxu0 }
 0x172   : > { %v1050_v58 = vpop.f32.mrf.mxu1  ;;  %v1032_v15 = vadd.f32 %v1031_v57, %v988_v62 }
 0x173   : > { %v1051_v18 = vadd.f32 %v1050_v58, %v988_v62 }
 0x174   : > { %v1060_v27 = vmax.f32 %v1032_v15, 0.0 }
 0x175   : > { %v1061_v28 = vmax.f32 %v1051_v18, 0.0 }
 0x179   : > { %v1033_v59 = vpop.f32.mrf.mxu0 }
 0x17a   : > { %v1052_v60 = vpop.f32.mrf.mxu1  ;;  %v1034_v9 = vadd.f32 %v1033_v59, %v993_v7 }
 0x17b   : > { %v1053_v12 = vadd.f32 %v1052_v60, %v993_v7 }
 0x17c   : > { %v1062_v21 = vmax.f32 %v1034_v9, 0.0 }
 0x17d   : > { %v1063_v25 = vmax.f32 %v1053_v12, 0.0 }
 0x17e   : > { %v1072_v29 = vpack.c.bf16 %v1062_v21, %v1060_v27 }
 0x17f   : > { %v1073_v30 = vpack.c.bf16 %v1063_v25, %v1061_v28 }
 0x181   : > { %v1036_v63 = vpop.f32.mrf.mxu0 }
 0x182   : > { %v1055_v2 = vpop.f32.mrf.mxu1  ;;  %v1037_v5 = vadd.f32 %v1036_v63, %v998_v61 }
 0x183   : > { %v1056_v4 = vadd.f32 %v1055_v2, %v998_v61  ;;  %v1586_v2 = vld [vmem:[%s2095_s6] sm:$0xff] }
 0x184   : > { %v1064_v16 = vmax.f32 %v1037_v5, 0.0 }
 0x185   : > { %v1065_v19 = vmax.f32 %v1056_v4, 0.0 }
 0x189   : > { %v1038_v8 = vpop.f32.mrf.mxu0 }
 0x18a   : > { %v1039_v10 = vadd.f32 %v1038_v8, %v1003_v3  ;;  %v1057_v11 = vpop.f32.mrf.mxu1  ;;  %v1188_v8 = vpop.permute.xlu2 %1187 }
 0x18b   : > { %v1058_v14 = vadd.f32 %v1057_v11, %v1003_v3  ;;  %v1587_v3 = vld [vmem:[%s2095_s6 + $0x8] sm:$0xff]  ;;  %v1193_v11 = vpop.permute.xlu0 %1192 }
 0x18c   : > { %v1066_v17 = vmax.f32 %v1039_v10, 0.0 }
 0x18d   : > { %v1067_v20 = vmax.f32 %v1058_v14, 0.0 }
 0x18e   : > { %v1074_v22 = vpack.c.bf16 %v1066_v17, %v1064_v16 }
 0x18f   : > { %v1075_v26 = vpack.c.bf16 %v1067_v20, %v1065_v19  ;;  %v1178_v20 = vpop.permute.xlu1 %1177 }
 0x190   : > { %1123 = vmatpush.bf16.msra.mxu2 %v1074_v22 }
 0x191   : > { %1142 = vmatpush.bf16.msra.mxu3 %v1075_v26 }
 0x192   : > { %v1183_v14 = vpop.permute.xlu2 %1182 }
 0x194   : > { %1124 = vmatpush.bf16.msra.mxu2 %v1072_v29 }
 0x195   : > { %1143 = vmatpush.bf16.msra.mxu3 %v1073_v30 }
 0x197   : > { %1543 = vmatmul.msk.bf16.vlgmr.msra.gmra.mxu2 %vm1110_vm7, %v1584_v32 }
 0x198   : > { %1545 = vmatmul.msk.bf16.vlgmr.msra.gmra.mxu3 %vm1110_vm7, %v1584_v32 }
 0x1a7   : > { %1544 = vmatmul.msk.bf16.gmra.mxu2 %vm1110_vm7, %v1585_v0 }
 0x1a8   : > { %1546 = vmatmul.msk.bf16.gmra.mxu3 %vm1110_vm7, %v1585_v0 }
 0x21a   : > { %v1126_v36 = vpop.f32.mrf.mxu2 }
 0x21b   : > { %v1145_v37 = vpop.f32.mrf.mxu3  ;;  %v1127_v50 = vadd.f32 %v1126_v36, %v1083_v47 }
 0x21c   : > { %v1146_v53 = vadd.f32 %v1145_v37, %v1083_v47 }
 0x21d   : > { %v1155_v60 = vmax.f32 %v1127_v50, 0.0 }
 0x21e   : > { %v1156_v61 = vmax.f32 %v1146_v53, 0.0 }
 0x222   : > { %v1128_v38 = vpop.f32.mrf.mxu2 }
 0x223   : > { %v1147_v13 = vpop.f32.mrf.mxu3  ;;  %v1129_v45 = vadd.f32 %v1128_v38, %v1088_v41  ;;  %v1588_v38 = vld [vmem:[%s2097_s8] sm:$0xff] }
 0x224   : > { %v1148_v48 = vadd.f32 %v1147_v13, %v1088_v41  ;;  %v1589_v13 = vld [vmem:[%s2097_s8 + $0x8] sm:$0xff] }
 0x225   : > { %v1157_v56 = vmax.f32 %v1129_v45, 0.0 }
 0x226   : > { %v1158_v58 = vmax.f32 %v1148_v48, 0.0 }
 0x227   : > { %v1167_v62 = vpack.c.bf16 %v1157_v56, %v1155_v60 }
 0x228   : > { %v1168_v63 = vpack.c.bf16 %v1158_v58, %v1156_v61 }
 0x22a   : > { %v1131_v40 = vpop.f32.mrf.mxu2 }
 0x22b   : > { %v1150_v23 = vpop.f32.mrf.mxu3  ;;  %v1132_v42 = vadd.f32 %v1131_v40, %v1093_v39 }
 0x22c   : > { %v1151_v43 = vadd.f32 %v1150_v23, %v1093_v39 }
 0x22d   : > { %v1159_v51 = vmax.f32 %v1132_v42, 0.0  ;;  %v1282_v42 = vpop.permute.xlu0 %1281 }
 0x22e   : > { %v1160_v54 = vmax.f32 %v1151_v43, 0.0 }
 0x232   : > { %v1133_v44 = vpop.f32.mrf.mxu2 }
 0x233   : > { %v1134_v46 = vadd.f32 %v1133_v44, %v1098_v31  ;;  %v1152_v24 = vpop.f32.mrf.mxu3  ;;  %v1287_v44 = vpop.permute.xlu1 %1286 }
 0x234   : > { %v1153_v49 = vadd.f32 %v1152_v24, %v1098_v31 }
 0x235   : > { %v1161_v52 = vmax.f32 %v1134_v46, 0.0  ;;  %v1277_v46 = vpop.permute.xlu0 %1276 }
 0x236   : > { %v1162_v55 = vmax.f32 %v1153_v49, 0.0 }
 0x237   : > { %v1169_v57 = vpack.c.bf16 %v1161_v52, %v1159_v51  ;;  %v1272_v51 = vpop.permute.xlu2 %1271 }
 0x238   : > { %v1170_v59 = vpack.c.bf16 %v1162_v55, %v1160_v54 }
 0x239   : > { %1217 = vmatpush.bf16.msrb.mxu2 %v1169_v57 }
 0x23a   : > { %1236 = vmatpush.bf16.msrb.mxu3 %v1170_v59 }
 0x23d   : > { %1218 = vmatpush.bf16.msrb.mxu2 %v1167_v62 }
 0x23e   : > { %1237 = vmatpush.bf16.msrb.mxu3 %v1168_v63 }
 0x240   : > { %1555 = vmatmul.msk.bf16.vlgmr.msrb.gmra.mxu2 %vm1110_vm7, %v1586_v2 }
 0x241   : > { %1557 = vmatmul.msk.bf16.vlgmr.msrb.gmra.mxu3 %vm1110_vm7, %v1586_v2 }
 0x250   : > { %1556 = vmatmul.msk.bf16.gmra.mxu2 %vm1110_vm7, %v1587_v3 }
 0x251   : > { %1558 = vmatmul.msk.bf16.gmra.mxu3 %vm1110_vm7, %v1587_v3 }
 0x2c3   : > { %v1220_v5 = vpop.f32.mrf.mxu2 }
 0x2c4   : > { %v1239_v6 = vpop.f32.mrf.mxu3  ;;  %v1221_v1 = vadd.f32 %v1220_v5, %v1178_v20 }
 0x2c5   : > { %v1240_v27 = vadd.f32 %v1239_v6, %v1178_v20 }
 0x2c6   : > { %v1249_v0 = vmax.f32 %v1221_v1, 0.0 }
 0x2c7   : > { %v1250_v35 = vmax.f32 %v1240_v27, 0.0 }
 0x2cb   : > { %v1222_v7 = vpop.f32.mrf.mxu2 }
 0x2cc   : > { %v1241_v4 = vpop.f32.mrf.mxu3  ;;  %v1223_v17 = vadd.f32 %v1222_v7, %v1183_v14  ;;  %v1351_v7 = vld [vmem:[%s2099_s10] sm:$0x3] }
 0x2cd   : > { %v1242_v21 = vadd.f32 %v1241_v4, %v1183_v14  ;;  %v1360_v4 = vpop.permute.xlu1 %1359 }
 0x2ce   : > { %v1251_v30 = vmax.f32 %v1223_v17, 0.0 }
 0x2cf   : > { %v1252_v33 = vmax.f32 %v1242_v21, 0.0 }
 0x2d0   : > { %v1261_v36 = vpack.c.bf16 %v1251_v30, %v1249_v0 }
 0x2d1   : > { %v1262_v37 = vpack.c.bf16 %v1252_v33, %v1250_v35 }
 0x2d3   : > { %v1225_v9 = vpop.f32.mrf.mxu2 }
 0x2d4   : > { %v1244_v10 = vpop.f32.mrf.mxu3  ;;  %v1226_v12 = vadd.f32 %v1225_v9, %v1188_v8 }
 0x2d5   : > { %v1245_v15 = vadd.f32 %v1244_v10, %v1188_v8 }
 0x2d6   : > { %v1253_v25 = vmax.f32 %v1226_v12, 0.0 }
 0x2d7   : > { %v1254_v28 = vmax.f32 %v1245_v15, 0.0 }
 0x2db   : > { %v1227_v16 = vpop.f32.mrf.mxu2 }
 0x2dc   : > { %v1228_v18 = vadd.f32 %v1227_v16, %v1193_v11  ;;  %v1246_v19 = vpop.f32.mrf.mxu3 }
 0x2dd   : > { %v1247_v22 = vadd.f32 %v1246_v19, %v1193_v11 }
 0x2de   : > { %v1255_v26 = vmax.f32 %v1228_v18, 0.0 }
 0x2df   : > { %v1256_v29 = vmax.f32 %v1247_v22, 0.0 }
 0x2e0   : > { %v1263_v32 = vpack.c.bf16 %v1255_v26, %v1253_v25 }
 0x2e1   : > { %v1264_v34 = vpack.c.bf16 %v1256_v29, %v1254_v28 }
 0x2e2   : > { %1311 = vmatpush.bf16.msrb.mxu0 %v1263_v32 }
 0x2e3   : > { %1330 = vmatpush.bf16.msrb.mxu1 %v1264_v34 }
 0x2e6   : > { %1312 = vmatpush.bf16.msrb.mxu0 %v1261_v36 }
 0x2e7   : > { %1331 = vmatpush.bf16.msrb.mxu1 %v1262_v37 }
 0x2e9   : > { %1567 = vmatmul.msk.bf16.vlgmr.msrb.gmra.mxu0 %vm1110_vm7, %v1588_v38 }
 0x2ea   : > { %1569 = vmatmul.msk.bf16.vlgmr.msrb.gmra.mxu1 %vm1110_vm7, %v1588_v38 }
 0x2f9   : > { %1568 = vmatmul.msk.bf16.gmra.mxu0 %vm1110_vm7, %v1589_v13 }
 0x2fa   : > { %1570 = vmatmul.msk.bf16.gmra.mxu1 %vm1110_vm7, %v1589_v13 }
 0x366   : > { %v1314_v39 = vpop.f32.mrf.mxu0 }
 0x367   : > { %v1333_v40 = vpop.f32.mrf.mxu1  ;;  %v1315_v54 = vadd.f32 %v1314_v39, %v1272_v51 }
 0x368   : > { %v1334_v57 = vadd.f32 %v1333_v40, %v1272_v51 }
 0x369   : > { %v1343_v2 = vmax.f32 %v1315_v54, 0.0 }
 0x36a   : > { %v1344_v3 = vmax.f32 %v1334_v57, 0.0 }
 0x36e   : > { %v1316_v23 = vpop.f32.mrf.mxu0 }
 0x36f   : > { %v1335_v41 = vpop.f32.mrf.mxu1  ;;  %v1317_v48 = vadd.f32 %v1316_v23, %v1277_v46 }
 0x370   : > { %v1336_v52 = vadd.f32 %v1335_v41, %v1277_v46 }
 0x371   : > { %v1345_v60 = vmax.f32 %v1317_v48, 0.0 }
 0x372   : > { %v1346_v62 = vmax.f32 %v1336_v52, 0.0 }
 0x373   : > { %v1352_v5 = vpack.c.bf16 %v1345_v60, %v1343_v2 }
 0x374   : > { %v1353_v6 = vpack.c.bf16 %v1346_v62, %v1344_v3 }
 0x376   : > { %v1319_v31 = vpop.f32.mrf.mxu0 }
 0x377   : > { %v1338_v43 = vpop.f32.mrf.mxu1  ;;  %v1320_v45 = vadd.f32 %v1319_v31, %v1282_v42 }
 0x378   : > { %v1339_v24 = vadd.f32 %v1338_v43, %v1282_v42 }
 0x379   : > { %v1347_v55 = vmax.f32 %v1320_v45, 0.0 }
 0x37a   : > { %v1348_v58 = vmax.f32 %v1339_v24, 0.0 }
 0x37e   : > { %v1321_v47 = vpop.f32.mrf.mxu0 }
 0x37f   : > { %v1322_v49 = vadd.f32 %v1321_v47, %v1287_v44  ;;  %v1340_v50 = vpop.f32.mrf.mxu1 }
 0x380   : > { %v1341_v53 = vadd.f32 %v1340_v50, %v1287_v44 }
 0x381   : > { %v1349_v56 = vmax.f32 %v1322_v49, 0.0 }
 0x382   : > { %v1350_v59 = vmax.f32 %v1341_v53, 0.0 }
 0x383   : > { %v1354_v61 = vpack.c.bf16 %v1349_v56, %v1347_v55 }
 0x384   : > { %v1355_v63 = vpack.c.bf16 %v1350_v59, %v1348_v58 }
 0x385   : > { %1371 = vmatpush.bf16.msra.mxu2 %v1354_v61 }
 0x386   : > { %1384 = vmatpush.bf16.msra.mxu3 %v1355_v63 }
 0x389   : > { %1372 = vmatpush.bf16.msra.mxu2 %v1352_v5 }
 0x38a   : > { %1385 = vmatpush.bf16.msra.mxu3 %v1353_v6 }
 0x38c   : > { %1571 = vmatmul.msk.bf16.vlgmr.msra.gmra.mxu2 %vm1110_vm7, %v1351_v7 }
 0x38d   : > { %1572 = vmatmul.msk.bf16.vlgmr.msra.gmra.mxu3 %vm1110_vm7, %v1351_v7 }
 0x40f   : > { %v1374_v8 = vpop.f32.mrf.mxu2 }
 0x410   : > { %v1375_v9 = vadd.f32 %v1374_v8, %v1360_v4  ;;  %v1387_v10 = vpop.f32.mrf.mxu3 }
 0x411   : > { %v1388_v11 = vadd.f32 %v1387_v10, %v1360_v4 }
 0x412   : > { %v1391_v12 = vsub.f32 0.0, %v1375_v9 }
 0x413   : > { %v1392_v14 = vsub.f32 0.0, %v1388_v11 }
 0x414   : > { %v1393_v15 = vmul.f32 1.442695, %v1391_v12 }
 0x415   : > { %v1395_v16 = vmul.f32 1.442695, %v1392_v14 }
 0x416   : > { %1640 = vpow2.f32 %v1393_v15 }
 0x417   : > { %1642 = vpow2.f32 %v1395_v16  ;;  %v1376_v17 = vpop.f32.mrf.mxu2 }
 0x418   : > { %v1389_v18 = vpop.f32.mrf.mxu3 }
 0x41c   : > { %v1641_v19 = vpop.eup %1640 }
 0x41d   : > { %v1643_v20 = vpop.eup %1642  ;;  %v1397_v21 = vadd.f32 1.0, %v1641_v19 }
 0x41e   : > { %v1398_v22 = vadd.f32 1.0, %v1643_v20 }
 0x420   : > { %1644 = vrcp.f32 %v1398_v22 }
 0x421   : > { %1646 = vrcp.f32 %v1397_v21 }
 0x426   : > { %v1645_v1 = vpop.eup %1644  ;;  %1415 = sbr.rel (!%p1835_p5) target bundleno = 1098 (0x44a), region = 72 }
 0x427   : > { %v1403_v25 = vrot.slane %v1645_v1, 4  ;;  %v1647_v26 = vpop.eup %1646 }
 0x429   : > { %v1405_v27 = vsel %vm1404_vm8, %v1647_v26, %v1403_v25 }
 0x42a   : > { %1407 = vst [vmem:[%s447_s20] sm:$0x77] %v1405_v27 }
 0x42b   : > { %s2122_s28 = smov (!%p1418_p11, %s1417_s28), 2 }
 0x42c   : > { %s1575_s29 = sshll.u32 %s2122_s28, 2 }
 0x42d   : > { %s1421_s18 = ssub.s32 8, %s1575_s29 }
 0x42e   : > { %s1422_s16 = sshll.u32 %s1421_s18, 4 }
 0x42f   : > { %1423 = vsyncadd %s2034_s26, %s1422_s16  ;;  %p2043_p12 = scmp.ne.s32.totalorder %s1575_s29, 0  ;;  %s1590_s13 = sshll.u32 %s1818_s25, 3 }
 0x430   : > { %s1426_s15 = scalar_lea.hbm %s2101_s12, %s1590_s13  ;;  %s2102_s1 = sshll.u32 %s2122_s28, 6 }
 0x431   : > { %s2052_s2 = sshll.u32 %s447_s20, 4  ;;  %s1431_s3 = sshll.u32 %s1426_s15, 4  ;;  %s1430_s2 = int_to_ptr.vmem [resolvable:$true] %s2052_s2  ;;  %s1432_s3 = int_to_ptr.hbm [resolvable:$true] %s1431_s3 }
 0x432   : > { %s1648_s18 = sshra.s32 %s1430_s2, 4  ;;  %s1650_s29 = sshrl.u32 %s2102_s1, 4  ;;  %s1649_s18 = int_to_ptr.vmem [resolvable:$true] %s1648_s18 }
 0x433   : > { %s1655_s16 = scalar_lea.vmem %s1649_s18, %s1650_s29  ;;  %s1731_s25 = smov [#allocation3]  }
 0x434   : > { %p1656_p13 = scmp.ne.s32.totalorder %s1649_s18, %s1655_s16  ;;  %s1659_s4 = scalar_lea.vmem %s1731_s25, 16 }
 0x435   : > { %p1661_p2 = scmp.lt.s32.totalorder %s1659_s4, %s1655_s16 }
 0x436   : > { %p1657_p0 = pnand %p1656_p13, %p2043_p12 }
 0x438   : > { %p1658_p1 = pneg %p1657_p0 }
 0x43a   : > { %p1663_p3 = pnand %p1661_p2, %p1658_p1 }
 0x43c   : > { %1666 = shalt.err (!%p1663_p3)
}
 0x43d   : > { %s1667_s20 = sshra.s32 %s1432_s3, 4  ;;  %s1678_s15 = scalar_lea.hbm %s2101_s12, 20  ;;  %s1668_s20 = int_to_ptr.hbm [resolvable:$true] %s1667_s20 }
 0x43e   : > { %s1674_s13 = scalar_lea.hbm %s1668_s20, %s1650_s29  ;;  %p1679_p8 = scmp.lt.s32.totalorder %s1668_s20, %s2101_s12 }
 0x43f   : > { %p1675_p4 = scmp.ne.s32.totalorder %s1668_s20, %s1674_s13  ;;  %p1680_p9 = scmp.lt.s32.totalorder %s1678_s15, %s1674_s13 }
 0x441   : > { %p1676_p5 = pnand %p1675_p4, %p2043_p12  ;;  %p1681_p10 = por %p1680_p9, %p1679_p8 }
 0x443   : > { %p1677_p7 = pneg %p1676_p5 }
 0x445   : > { %p1682_p11 = pnand %p1681_p10, %p1677_p7 }
 0x447   : > { %1685 = shalt.err (!%p1682_p11)
}
 0x448   : > { %s2116_s4 = sshll.u32 %s2122_s28, 6 }
 0x449   : > { %1434 = dma.vmem_to_hbm [thread:$0]  (%p2043_p12), %s1430_s2, %s2116_s4, %s1432_s3, %s2034_s26  }
 0x44a PF: > { %p1596_p13 = scmp.ge.s32.totalorder %s1721_s24, 2  ;;  %s1443_s29 = sand.u32 1, %s1709_s21  }
 0x44b   : > { %s1444_s1 = scalar_lea.sflag [#allocation4], %s1443_s29 }
 0x44c   : > { %p1593_p0 = pnand %p1596_p13, %p1839_p6 }
 0x44e   : > { %p1594_p1 = pneg %p1593_p0 }
 0x450   : > { %1704 = dma.done.wait (%p1594_p1), %s1444_s1, 128  }
 0x451   : > { %1706 = vsyncadd (%p1594_p1), %s1444_s1, 4294967168  ;;  %p22_p2 = scmp.ge.s32.totalorder %s1822_s27, 5   ;;  %s2117_s21 = smov %s1713_s22 }
 0x452   : > { %s2118_s22 = smov %s1717_s23  ;;  %s2119_s23 = smov %s1833_s30 }
 0x453   : > { %s2120_s24 = smov %s1822_s27  ;;  %24 = sbr.rel (!%p22_p2) target bundleno = 9 (0x9), region = 109 }
 0x458   :  { %1450 = vsyncpa [#allocation4], 1 }
 0x459   :  { %1452 = vsyncpa [#allocation4 + $0x1], 1 }

</bundles_post_ra>
